<compile_context>
chip_gen: v6e
topology: v6e:2x2x1
jax: 0.10.0
libtpu: 0.0.40
codegen_flags: <defaults>
</compile_context>

<pallas_src>
import functools
from types import SimpleNamespace

import jax
import jax.numpy as jnp
from jax import lax
from jax.experimental import pallas as pl
from jax.experimental.pallas import tpu as pltpu


def _dtrg_kernel(xf_ref, centers_ref, matn_ref, sim_ref, out_ref, xfn_ref,
                 *, tau, eta, weight_cent):
    j = pl.program_id(0)
    inv_tau = 1.0 / tau

    b = xf_ref.shape[0]
    inv_b = 1.0 / float(b)

    # ---- one-time work (first class block): center loss + hoisted xf norm.
    @pl.when(j == 0)
    def _():
        xf = xf_ref[...]                                      # (B, D) f32
        # rsqrt (EUP) * mul; 1/tau folded so the matmul output is already the
        # scaled logits.  No epsilon, matching the PyTorch reference.
        xf_n = xf * (lax.rsqrt(jnp.sum(xf * xf, axis=-1, keepdims=True)) * inv_tau)
        xfn_ref[...] = xf_n.astype(jnp.bfloat16)
        # center loss (ocl=True); centers = matrix[target] arrives as an input.
        diff = xf - centers_ref[...]
        out_ref[...] = jnp.sum(diff * diff, keepdims=True) * (weight_cent * inv_b)

    # ---- graph similarity loss (graph=True, distmethod='eu'), per class block.
    # matn_ref is the pre-normalized bf16 class matrix block; contraction on
    # the last dim of BOTH operands -> no in-kernel transpose materialized.
    q_logits = lax.dot_general(
        xfn_ref[...], matn_ref[...],
        dimension_numbers=(((1,), (1,)), ((), ())),
        preferred_element_type=jnp.float32)                   # (B, tc) f32
    sim = sim_ref[...]                                        # (B, tc) f32
    pq = jnp.exp(sim * inv_tau) - jnp.exp(q_logits)
    out_ref[...] += jnp.sum(pq * pq, keepdims=True) * (eta * inv_b)


def _vmem_budget_and_limit():
    """Per-generation VMEM budget (half of physical, floor 16 MiB)."""
    try:
        cap = int(pltpu.get_tpu_info().vmem_capacity_bytes)
    except Exception:
        cap = 64 << 20  # conservative: v7x per-TC physical VMEM
    budget = max(cap // 2, 16 << 20)
    return budget, budget


def _pick_block_c(c, b, d, budget_bytes):
    """Largest lane-aligned divisor of C whose streaming tiles fit the budget."""
    def vmem_cost(bc):
        return (3 * bc * d * 2        # normalized bf16 matrix block (<=3 buffers)
                + 3 * b * bc * 4      # sim slab (<=3 buffers)
                + 2 * 2 * b * d * 4   # xf + centers (block-invariant inputs)
                + b * d * 2           # xf_n bf16 scratch
                + (8 << 10))          # output + slack
    if vmem_cost(c) <= budget_bytes:
        return c                      # whole class dim in one block
    for cand in (8192, 4096, 2048, 1024, 512, 256, 128):
        if cand < c and c % cand == 0 and vmem_cost(cand) <= budget_bytes:
            return cand
    # TODO(synk): pad + explicit column mask for awkward C (zero-padding alone
    # is unsafe for the graph loss since exp(0) - exp(q_pad) != 0).
    raise NotImplementedError(
        "num_class must have a 128-aligned divisor fitting the VMEM budget")


def dtrg_loss_pallas(xf, matrix_norm_bf16, centers, sim_rows, *, tau, eta,
                     weight_cent):
    b, d = xf.shape
    c = matrix_norm_bf16.shape[0]

    budget, vmem_limit = _vmem_budget_and_limit()
    block_c = _pick_block_c(c, b, d, budget)
    num_blocks = c // block_c
    grid = (num_blocks,)

    # Triple-buffer the two streaming inputs only when the class grid is long
    # enough for pipeline depth to matter.
    if num_blocks >= 3:
        mat_spec = pl.BlockSpec((block_c, d), lambda j: (j, 0),
                                pipeline_mode=pl.Buffered(3))
        sim_spec = pl.BlockSpec((b, block_c), lambda j: (0, j),
                                pipeline_mode=pl.Buffered(3))
    else:
        mat_spec = pl.BlockSpec((block_c, d), lambda j: (j, 0))
        sim_spec = pl.BlockSpec((b, block_c), lambda j: (0, j))

    kernel = functools.partial(
        _dtrg_kernel, tau=float(tau), eta=float(eta),
        weight_cent=float(weight_cent))

    cost = pl.CostEstimate(
        flops=2 * b * c * d + 6 * b * c + 5 * b * d,
        transcendentals=2 * b * c + b,
        bytes_accessed=2 * b * d * 4 + c * d * 2 + b * c * 4 + 4,
    )

    out = pl.pallas_call(
        kernel,
        out_shape=jax.ShapeDtypeStruct((1, 1), jnp.float32),
        grid_spec=pltpu.PrefetchScalarGridSpec(
            num_scalar_prefetch=0,
            grid=grid,
            in_specs=[
                pl.BlockSpec((b, d), lambda j: (0, 0)),   # xf       (B, D) f32
                pl.BlockSpec((b, d), lambda j: (0, 0)),   # centers  (B, D) f32
                mat_spec,                                 # matrix_n (block_c, D) bf16
                sim_spec,                                 # sim rows (B, block_c) f32
            ],
            out_specs=pl.BlockSpec((1, 1), lambda j: (0, 0)),
            scratch_shapes=[pltpu.VMEM((b, d), jnp.bfloat16)],  # hoisted xf_n
        ),
        compiler_params=pltpu.CompilerParams(
            dimension_semantics=("arbitrary",),
            vmem_limit_bytes=vmem_limit),
        cost_estimate=cost,
    )(xf, centers, matrix_norm_bf16, sim_rows)
    return out[0, 0]


class DTRGJax:
    """JAX/Pallas port of the PyTorch DTRG module (forward pass)."""

    def __init__(self, conf, feat_dim, key):
        self.feat_dim = feat_dim
        self.num_classes = conf.num_class
        self.start_dtrg = conf.start_dtrg
        self.ocl = conf.ocl
        self.weight_cent = conf.weight_cent
        self.graph = conf.graph
        self.distmethod = conf.distmethod
        self.tau = conf.tau
        self.eta = conf.eta
        self.training = True

        # deterministic parameter init (matches torch.randn shapes)
        self.matrix = jax.random.normal(key, (self.num_classes, feat_dim),
                                        dtype=jnp.float32)
        self.grad = jnp.zeros((self.num_classes, feat_dim), jnp.float32)
        self.count = jnp.zeros((self.num_classes, 1), jnp.float32)
        self._refresh_cached()

    def _refresh_cached(self):
        # Row-normalized matrix: kept in f32 (for graph_weight_matrix) and as a
        # cached bf16 copy fed to the kernel (halves the streaming HBM bytes;
        # refreshed only when the matrix changes, never per forward call).
        matrix_norm = self.matrix / jnp.linalg.norm(self.matrix, axis=-1,
                                                    keepdims=True)
        self.graph_weight_matrix = matrix_norm @ matrix_norm.T
        self.matrix_norm_bf16 = matrix_norm.astype(jnp.bfloat16)

    def update(self):
        # mirrors the torch update(): class means overwrite observed rows.
        idx = jnp.where(self.count[:, 0] > 0, size=self.num_classes,
                        fill_value=-1)[0]
        mask = (idx >= 0)
        safe_idx = jnp.where(mask, idx, 0)
        new_rows = self.grad[safe_idx] / jnp.maximum(self.count[safe_idx], 1.0)
        self.matrix = self.matrix.at[safe_idx].set(
            jnp.where(mask[:, None], new_rows, self.matrix[safe_idx]))
        self.grad = jnp.zeros_like(self.grad)
        self.count = jnp.zeros_like(self.count)
        self._refresh_cached()

    def forward(self, xf, target, epoch):
        if self.training:
            # state update (no_grad index_add_) -- plain-JAX scatter-add glue
            self.grad = self.grad.at[target].add(xf)
            self.count = self.count.at[target, 0].add(1.0)

        if epoch >= self.start_dtrg:
            if not (self.ocl and self.graph and self.distmethod == "eu"):
                # TODO(synk): distmethod == 'kl' (softmax + KL) branch and the
                # ocl/graph=False configurations are not implemented in the kernel.
                raise NotImplementedError(
                    "Pallas DTRG kernel implements ocl=True, graph=True, "
                    "distmethod='eu' only")
            # Tiny per-row gathers stay as JAX glue; the kernel streams the
            # cached normalized bf16 class matrix.
            sim_rows = self.graph_weight_matrix[target]   # (B, C) f32
            centers = self.matrix[target]                 # (B, D) f32
            return dtrg_loss_pallas(
                xf, self.matrix_norm_bf16, centers, sim_rows,
                tau=self.tau, eta=self.eta, weight_cent=self.weight_cent,
            )
        return jnp.float32(0.0)


def _reference_loss(mod, xf, target):
    centers = mod.matrix[target]
    center_loss = jnp.mean(jnp.sum((xf - centers) ** 2, axis=-1)) * mod.weight_cent
    xf_norm = xf / jnp.linalg.norm(xf, axis=-1, keepdims=True)
    mat_norm = mod.matrix / jnp.linalg.norm(mod.matrix, axis=-1, keepdims=True)
    q_logits = xf_norm @ mat_norm.T
    p = jnp.exp(mod.graph_weight_matrix[target] / mod.tau)
    q = jnp.exp(q_logits / mod.tau)
    eu = jnp.mean(jnp.sum((p - q) ** 2, axis=-1))
    return eu * mod.eta + center_loss


if __name__ == "__main__":
    conf = SimpleNamespace(
        num_class=32, start_dtrg=0, ocl=True, weight_cent=0.5,
        graph=True, distmethod="eu", tau=2.0, eta=1.0,
    )
    feat_dim = 128   # lane-dense last dim (multiple of 128)
    batch = 8        # multiple of 8 sublanes

    root = jax.random.PRNGKey(0)
    k_mat, k_x, k_t = jax.random.split(root, 3)

    module = DTRGJax(conf, feat_dim, k_mat)
    xf = jax.random.normal(k_x, (batch, feat_dim), dtype=jnp.float32)
    target = jax.random.randint(k_t, (batch,), 0, conf.num_class, dtype=jnp.int32)

    loss = module.forward(xf, target, epoch=1)
    loss = jax.block_until_ready(loss)

    ref = _reference_loss(module, xf, target)
    # bf16 MXU operands for the similarity matmul -> slightly looser tolerance;
    # the center-loss term is exact f32.
    assert jnp.allclose(loss, ref, rtol=1e-2, atol=1e-2), (loss, ref)

    print("KERNEL_OK")
</pallas_src>

<mosaic_0001>
module attributes {stable_mosaic.version = 11 : i64} {
  func.func @_dtrg_kernel(%arg0: i32, %arg1: memref<8x128xf32, #tpu.memory_space<vmem>>, %arg2: memref<8x128xf32, #tpu.memory_space<vmem>>, %arg3: memref<32x128xbf16, #tpu.memory_space<vmem>>, %arg4: memref<8x32xf32, #tpu.memory_space<vmem>>, %arg5: memref<1x1xf32, #tpu.memory_space<vmem>>, %arg6: memref<8x128xbf16, #tpu.memory_space<vmem>>) attributes {dimension_semantics = [#tpu.dimension_semantics<arbitrary>], iteration_bounds = array<i64: 1>, scalar_prefetch = 0 : i64, scratch_operands = 1 : i64, tpu.core_type = #tpu.core_type<tc>, window_params = [{pipeline_mode = #tpu.pipeline_mode<synchronous>, transform_indices = @transform_0, window_bounds = array<i64: 8, 128>}, {pipeline_mode = #tpu.pipeline_mode<synchronous>, transform_indices = @transform_1, window_bounds = array<i64: 8, 128>}, {transform_indices = @transform_2, window_bounds = array<i64: 32, 128>}, {transform_indices = @transform_3, window_bounds = array<i64: 8, 32>}, {pipeline_mode = #tpu.pipeline_mode<synchronous>, transform_indices = @transform_4, window_bounds = array<i64: 1, 1>}]} {
    %c0_i32 = arith.constant 0 : i32
    %0 = arith.cmpi eq, %arg0, %c0_i32 : i32
    %1 = arith.extui %0 : i1 to i32
    %c0_i32_0 = arith.constant 0 : i32
    %2 = arith.cmpi ne, %1, %c0_i32_0 : i32
    scf.if %2 {
      %c0_13 = arith.constant 0 : index
      %c0_14 = arith.constant 0 : index
      %23 = vector.load %arg1[%c0_13, %c0_14] : memref<8x128xf32, #tpu.memory_space<vmem>>, vector<8x128xf32>
      %24 = arith.mulf %23, %23 : vector<8x128xf32>
      %cst_15 = arith.constant dense<0.000000e+00> : vector<8xf32>
      %25 = vector.multi_reduction <add>, %24, %cst_15 [1] : vector<8x128xf32> to vector<8xf32>
      %26 = vector.shape_cast %25 : vector<8xf32> to vector<8x1xf32>
      %27 = math.rsqrt %26 : vector<8x1xf32>
      %cst_16 = arith.constant 5.000000e-01 : f32
      %28 = vector.broadcast %cst_16 : f32 to vector<8x1xf32>
      %29 = arith.mulf %27, %28 : vector<8x1xf32>
      %30 = vector.broadcast %29 : vector<8x1xf32> to vector<8x128xf32>
      %31 = arith.mulf %23, %30 : vector<8x128xf32>
      %32 = arith.truncf %31 : vector<8x128xf32> to vector<8x128xbf16>
      %c0_17 = arith.constant 0 : index
      %c0_18 = arith.constant 0 : index
      %33 = vector.load %arg6[%c0_17, %c0_18] : memref<8x128xbf16, #tpu.memory_space<vmem>>, vector<8x128xbf16>
      tpu.vector_store %arg6[%c0_17, %c0_18], %32 {strides = array<i32>} : memref<8x128xbf16, #tpu.memory_space<vmem>>, vector<8x128xbf16>,
      %c0_19 = arith.constant 0 : index
      %c0_20 = arith.constant 0 : index
      %34 = vector.load %arg2[%c0_19, %c0_20] : memref<8x128xf32, #tpu.memory_space<vmem>>, vector<8x128xf32>
      %35 = arith.subf %23, %34 : vector<8x128xf32>
      %36 = arith.mulf %35, %35 : vector<8x128xf32>
      %37 = vector.shape_cast %36 : vector<8x128xf32> to vector<1x8x128xf32>
      %cst_21 = arith.constant dense<0.000000e+00> : vector<1xf32>
      %38 = vector.multi_reduction <add>, %37, %cst_21 [1, 2] : vector<1x8x128xf32> to vector<1xf32>
      %39 = vector.shape_cast %38 : vector<1xf32> to vector<1x1x1xf32>
      %40 = vector.extract %39[0, 0, 0] : f32 from vector<1x1x1xf32>
      %41 = vector.broadcast %40 : f32 to vector<1x1xf32>
      %cst_22 = arith.constant 6.250000e-02 : f32
      %42 = vector.broadcast %cst_22 : f32 to vector<1x1xf32>
      %43 = arith.mulf %41, %42 : vector<1x1xf32>
      %c0_23 = arith.constant 0 : index
      %c0_24 = arith.constant 0 : index
      %44 = vector.load %arg5[%c0_23, %c0_24] : memref<1x1xf32, #tpu.memory_space<vmem>>, vector<1x1xf32>
      tpu.vector_store %arg5[%c0_23, %c0_24], %43 {strides = array<i32>} : memref<1x1xf32, #tpu.memory_space<vmem>>, vector<1x1xf32>,
    } else {
    }
    %c0 = arith.constant 0 : index
    %c0_1 = arith.constant 0 : index
    %3 = vector.load %arg6[%c0, %c0_1] : memref<8x128xbf16, #tpu.memory_space<vmem>>, vector<8x128xbf16>
    %c0_2 = arith.constant 0 : index
    %c0_3 = arith.constant 0 : index
    %4 = vector.load %arg3[%c0_2, %c0_3] : memref<32x128xbf16, #tpu.memory_space<vmem>>, vector<32x128xbf16>
    %cst = arith.constant dense<0.000000e+00> : vector<8x32xf32>
    %5 = tpu.matmul %3, %4, %cst {dimension_numbers = #tpu.dot_dimension_numbers<[1], [1], [0], [0], [0, 0, 1, 0], [], []>} : vector<8x128xbf16>, vector<32x128xbf16>, vector<8x32xf32> -> vector<8x32xf32>
    %c0_4 = arith.constant 0 : index
    %c0_5 = arith.constant 0 : index
    %6 = vector.load %arg4[%c0_4, %c0_5] : memref<8x32xf32, #tpu.memory_space<vmem>>, vector<8x32xf32>
    %cst_6 = arith.constant 5.000000e-01 : f32
    %7 = vector.broadcast %cst_6 : f32 to vector<8x32xf32>
    %8 = arith.mulf %6, %7 : vector<8x32xf32>
    %9 = math.exp %8 : vector<8x32xf32>
    %10 = math.exp %5 : vector<8x32xf32>
    %11 = arith.subf %9, %10 : vector<8x32xf32>
    %c0_7 = arith.constant 0 : index
    %c0_8 = arith.constant 0 : index
    %12 = vector.load %arg5[%c0_7, %c0_8] : memref<1x1xf32, #tpu.memory_space<vmem>>, vector<1x1xf32>
    %13 = arith.mulf %11, %11 : vector<8x32xf32>
    %14 = vector.shape_cast %13 : vector<8x32xf32> to vector<1x8x32xf32>
    %cst_9 = arith.constant dense<0.000000e+00> : vector<1xf32>
    %15 = vector.multi_reduction <add>, %14, %cst_9 [1, 2] : vector<1x8x32xf32> to vector<1xf32>
    %16 = vector.shape_cast %15 : vector<1xf32> to vector<1x1x1xf32>
    %17 = vector.extract %16[0, 0, 0] : f32 from vector<1x1x1xf32>
    %18 = vector.broadcast %17 : f32 to vector<1x1xf32>
    %cst_10 = arith.constant 1.250000e-01 : f32
    %19 = vector.broadcast %cst_10 : f32 to vector<1x1xf32>
    %20 = arith.mulf %18, %19 : vector<1x1xf32>
    %21 = arith.addf %12, %20 : vector<1x1xf32>
    %c0_11 = arith.constant 0 : index
    %c0_12 = arith.constant 0 : index
    %22 = vector.load %arg5[%c0_11, %c0_12] : memref<1x1xf32, #tpu.memory_space<vmem>>, vector<1x1xf32>
    tpu.vector_store %arg5[%c0_11, %c0_12], %21 {strides = array<i32>} : memref<1x1xf32, #tpu.memory_space<vmem>>, vector<1x1xf32>,
    return
  }
  func.func @transform_0(%arg0: i32) -> (i32, i32) {
    %c0_i32 = arith.constant 0 : i32
    %c0_i32_0 = arith.constant 0 : i32
    %c0_i32_1 = arith.constant 0 : i32
    return %c0_i32, %c0_i32_0 : i32, i32
  }
  func.func @transform_1(%arg0: i32) -> (i32, i32) {
    %c0_i32 = arith.constant 0 : i32
    %c0_i32_0 = arith.constant 0 : i32
    %c0_i32_1 = arith.constant 0 : i32
    return %c0_i32, %c0_i32_0 : i32, i32
  }
  func.func @transform_2(%arg0: i32) -> (i32, i32) {
    %c0_i32 = arith.constant 0 : i32
    %c0_i32_0 = arith.constant 0 : i32
    return %arg0, %c0_i32 : i32, i32
  }
  func.func @transform_3(%arg0: i32) -> (i32, i32) {
    %c0_i32 = arith.constant 0 : i32
    %c0_i32_0 = arith.constant 0 : i32
    return %c0_i32, %arg0 : i32, i32
  }
  func.func @transform_4(%arg0: i32) -> (i32, i32) {
    %c0_i32 = arith.constant 0 : i32
    %c0_i32_0 = arith.constant 0 : i32
    %c0_i32_1 = arith.constant 0 : i32
    return %c0_i32, %c0_i32_0 : i32, i32
  }
}

</mosaic_0001>

<bundles_post_ra>
// kernel: tpu_custom_call.1
= control target key start
LH: loop header
LB: loop body
LE: loop exit
PB: predicated region body
PF: predicated region fallthrough
CT: control target
= control target key end

     0   :  { %9 = vsyncpa [#allocation4], 0  ;;  %s389_s0 = inlined_call_operand.hbm [shape: f32[8,128], index: 0, kind: input, shape index: {}]   ;;  %s390_s1 = inlined_call_operand.hbm [shape: f32[8,128], index: 1, kind: input, shape index: {}]   ;;  %s391_s2 = inlined_call_operand.hbm [shape: bf16[32,128], index: 2, kind: input, shape index: {}]   ;;  %s392_s3 = inlined_call_operand.hbm [shape: f32[8,32], index: 3, kind: input, shape index: {}]   ;;  %s393_s4 = inlined_call_operand.hbm [shape: f32[1,1], index: 4, kind: output, shape index: {}]  }
   0x1   :  { %10 = vsyncpa [#allocation7], 0 }
   0x2   :  { %11 = vsyncpa [#allocation10], 0 }
   0x3   :  { %12 = vsyncpa [#allocation5], 0  ;;  %s338_s15 = smov [#allocation6]   ;;  %s339_s17 = smov [#allocation3]  }
   0x4   :  { %s29_s16 = sshll.u32 %s338_s15, 4  ;;  %s19_s18 = sshll.u32 %s339_s17, 4  ;;  %s30_s16 = int_to_ptr.vmem [resolvable:$true] %s29_s16  ;;  %s20_s18 = int_to_ptr.vmem [resolvable:$true] %s19_s18 }
   0x5   :  { %s238_s19 = scalar_lea.vmem %s30_s16, 128  ;;  %p243_p1 = scmp.lt.s32.totalorder %s30_s16, %s30_s16 }
   0x6   :  { %p239_p0 = scmp.ne.s32.totalorder %s30_s16, %s238_s19  ;;  %p244_p2 = scmp.lt.s32.totalorder %s238_s19, %s238_s19 }
   0x8   :  { %p245_p3 = por %p244_p2, %p243_p1 }
   0xa   :  { %p246_p4 = pnand %p245_p3, %p239_p0 }
   0xc   :  { %249 = shalt.err (!%p246_p4)
}
   0xd   :  { %32 = dma.hbm_to_vmem [thread:$0]  %s390_s1, 128, %s30_s16, [#allocation7]  }
   0xe   :  { %s258_s22 = scalar_lea.vmem %s20_s18, 128  ;;  %p263_p6 = scmp.lt.s32.totalorder %s20_s18, %s20_s18 }
   0xf   :  { %p259_p5 = scmp.ne.s32.totalorder %s20_s18, %s258_s22  ;;  %p264_p7 = scmp.lt.s32.totalorder %s258_s22, %s258_s22 }
  0x11   :  { %p265_p8 = por %p264_p7, %p263_p6 }
  0x13   :  { %p266_p9 = pnand %p265_p8, %p259_p5 }
  0x15   :  { %269 = shalt.err (!%p266_p9)
}
  0x16   :  { %22 = dma.hbm_to_vmem [thread:$0]  %s389_s0, 128, %s20_s18, [#allocation4]  }
  0x17   :  { %s340_s25 = smov [#allocation8]  }
  0x18   :  { %s38_s26 = sshll.u32 %s340_s25, 4  ;;  %s39_s26 = int_to_ptr.vmem [resolvable:$true] %s38_s26 }
  0x19   :  { %s278_s27 = scalar_lea.vmem %s39_s26, 256  ;;  %p283_p11 = scmp.lt.s32.totalorder %s39_s26, %s39_s26 }
  0x1a   :  { %p279_p10 = scmp.ne.s32.totalorder %s39_s26, %s278_s27  ;;  %p284_p12 = scmp.lt.s32.totalorder %s278_s27, %s278_s27 }
  0x1c   :  { %p285_p13 = por %p284_p12, %p283_p11 }
  0x1e   :  { %p286_p0 = pnand %p285_p13, %p279_p10 }
  0x20   :  { %289 = shalt.err (!%p286_p0)
}
  0x21   :  { %s341_s1 = smov 64   ;;  %s342_s28 = smov 4  }
  0x22   :  { %44 = dma.hbm_to_vmem [thread:$0]  %s391_s2, 256, %s39_s26, [#allocation7], %s341_s1, %s341_s1, %s342_s28  }
  0x23   :  { %s343_s5 = smov [#allocation9]  }
  0x24   :  { %s51_s6 = sshll.u32 %s343_s5, 4  ;;  %s52_s6 = int_to_ptr.vmem [resolvable:$true] %s51_s6 }
  0x25   :  { %s298_s0 = scalar_lea.vmem %s52_s6, 128  ;;  %p303_p2 = scmp.lt.s32.totalorder %s52_s6, %s52_s6 }
  0x26   :  { %p299_p1 = scmp.ne.s32.totalorder %s52_s6, %s298_s0  ;;  %p304_p3 = scmp.lt.s32.totalorder %s298_s0, %s298_s0 }
  0x28   :  { %p305_p4 = por %p304_p3, %p303_p2 }
  0x2a   :  { %p306_p5 = pnand %p305_p4, %p299_p1 }
  0x2c   :  { %309 = shalt.err (!%p306_p5)
}
  0x2d   :  { %54 = dma.hbm_to_vmem [thread:$0]  %s392_s3, 128, %s52_s6, [#allocation10]  }
  0x2e   :  { %330 = dma.done.wait [#allocation4], 128  }
  0x2f   :  { %331 = vsyncadd [#allocation4], 4294967168 }
  0x30   :  { %332 = dma.done.wait [#allocation7], 384  }
  0x31   :  { %333 = vsyncadd [#allocation7], 4294966912 }
  0x32   :  { %334 = dma.done.wait [#allocation10], 128  }
  0x33   :  { %335 = vsyncadd [#allocation10], 4294967168  ;;  %v72_v0 = vld [vmem:[#allocation3] sm:$0xff]  ;;  %v222_v2 = vld [vmem:[#allocation8 + $0x8] sm:$0xff]   ;;  %v344_v3 = vmov 0.0   ;;  %vm345_vm0 = vmmov 0  }
  0x34   :  { %v73_v1 = vmul.f32 %v72_v0, %v72_v0  ;;  %201 = vmatprep.subr.bf16.mxu0 %v344_v3  ;;  %v223_v4 = vld [vmem:[#allocation8] sm:$0xff]   ;;  %205 = vmatprep.mubr.msk.bf16.mxu0 %vm345_vm0, %v344_v3  ;;  %v81_v11 = vld [vmem:[#allocation6] sm:$0xff]  ;;  %v154_v14 = vld [vmem:[#allocation9] sm:$0xff]  ;;  %vm163_vm1 = vcmask 261120   ;;  %vm95_vm2 = vcmask 0   ;;  %s346_s9 = smov [#allocation11]  }
  0x35   :  { %202 = vmatpush3.bf16.xpose.msra.mxu0 %v222_v2  ;;  %v82_v12 = vsub.f32 %v72_v0, %v81_v11  ;;  %v155_v15 = vmul.f32 0.5, %v154_v14  ;;  %s185_s10 = sshll.u32 %s346_s9, 4  ;;  %s186_s10 = int_to_ptr.vmem [resolvable:$true] %s185_s10 }
  0x36   :  { %74 = vadd.xlane.f32.xlu0 %v73_v1  ;;  %203 = vmatprep.subr.bf16.mxu0 %v344_v3  ;;  %s310_s11 = scalar_lea.vmem %s186_s10, 16  ;;  %s314_s12 = scalar_lea.vmem %s186_s10, 32 }
  0x37   :  { %v83_v13 = vmul.f32 %v82_v12, %v82_v12  ;;  %v156_v16 = vmul.f32 1.442695, %v155_v15  ;;  %p311_p6 = scmp.ne.s32.totalorder %s186_s10, %s310_s11  ;;  %p315_p7 = scmp.lt.s32.totalorder %s186_s10, %s186_s10 }
  0x38   :  { %p316_p8 = scmp.lt.s32.totalorder %s314_s12, %s310_s11 }
  0x3a   :  { %84 = vadd.xlane.f32.xlu0 %v83_v13  ;;  %p317_p9 = por %p316_p8, %p315_p7 }
  0x3c   :  { %p318_p10 = pnand %p317_p9, %p311_p6 }
  0x3d   :  { %204 = vmatpush3.bf16.xpose.msra.mxu0 %v223_v4 }
  0xbf   :  { %v75_v5 = vpop.xlane.xlu0 %74 }
  0xc0   :  { %224 = vrsqrt.f32 %v75_v5 }
  0xc1   :  { %226 = vpow2.f32 %v156_v16 }
  0xc3   :  { %v85_v25 = vpop.xlane.xlu0 %84 }
  0xc4   :  { %v86_v26 = vrot.slane %v85_v25, 4 }
  0xc6   :  { %v87_v28 = vadd.f32 %v86_v26, %v85_v25 }
  0xc8   :  { %v88_v30 = vrot.slane %v87_v28, 2 }
  0xca   :  { %v89_v31 = vadd.f32 %v88_v30, %v87_v28 }
  0xcc   :  { %v90_v32 = vrot.slane %v89_v31, 1 }
  0xcd   :  { %v225_v6 = vpop.eup %224 }
  0xce   :  { %v77_v7 = vmul.f32 0.5, %v225_v6  ;;  %v227_v22 = vpop.eup %226  ;;  %v91_v33 = vadd.f32 %v90_v32, %v89_v31 }
  0xd0   :  { %v78_v8 = vmul.f32 %v77_v7, %v72_v0  ;;  %209 = vpush %v91_v33 }
  0xd2   :  { %v79_v9 = vpack.c.bf16 %v78_v8, %v78_v8 }
  0xd4   :  { %80 = vst [vmem:[#allocation2] sm:$0xf] %v79_v9 }
  0xdb   :  { %v97_v10 = vld [vmem:[#allocation2] sm:$0xf] }
  0xdc   :  { %206 = vmatmul.mubr.bf16.vlgmr.msra.gmra.mxu0 %v97_v10 }
 0x101   :  { %s210_s2 = spop %209 }
 0x102   :  { %v93_v34 = vstv %s210_s2 }
 0x103   :  { %v94_v35 = vmul.f32 0.0625, %v93_v34 }
 0x105   :  { %96 = vst.msk [vmem:[#allocation11] sm:$0x1] %vm95_vm2, %v94_v35 }
 0x10c   :  { %v161_v45 = vld [vmem:[#allocation11] sm:$0x1] }
 0x19c   :  { %v148_v17 = vpop.f32.mrf.mxu0 }
 0x19d   :  { %v158_v18 = vmul.f32 1.442695, %v148_v17 }
 0x19e   :  { %v207_v19 = vpop.f32.mrf.mxu0 }
 0x19f   :  { %228 = vpow2.f32 %v158_v18 }
 0x1a0   :  { %v151_v20 = vpop.f32.mrf.mxu0 }
 0x1a2   :  { %v208_v21 = vpop.f32.mrf.mxu0 }
 0x1ac   :  { %v229_v23 = vpop.eup %228 }
 0x1ad   :  { %v160_v24 = vsub.f32 %v227_v22, %v229_v23 }
 0x1af   :  { %v162_v27 = vmul.f32 %v160_v24, %v160_v24 }
 0x1b1   :  { %v164_v29 = vsel %vm163_vm1, %v162_v27, 0.0 }
 0x1b2   :  { %165 = vadd.xlane.f32.xlu1 %v164_v29 }
 0x23b   :  { %v166_v36 = vpop.xlane.xlu1 %165 }
 0x23c   :  { %v167_v37 = vrot.slane %v166_v36, 4 }
 0x23e   :  { %v168_v38 = vadd.f32 %v167_v37, %v166_v36 }
 0x240   :  { %v169_v39 = vrot.slane %v168_v38, 2 }
 0x242   :  { %v170_v40 = vadd.f32 %v169_v39, %v168_v38 }
 0x244   :  { %v171_v41 = vrot.slane %v170_v40, 1 }
 0x246   :  { %v172_v42 = vadd.f32 %v171_v41, %v170_v40 }
 0x248   :  { %211 = vpush %v172_v42 }
 0x279   :  { %s212_s3 = spop %211 }
 0x27a   :  { %v174_v43 = vstv %s212_s3 }
 0x27b   :  { %v175_v44 = vmul.f32 0.125, %v174_v43 }
 0x27d   :  { %v176_v46 = vadd.f32 %v175_v44, %v161_v45 }
 0x27f   :  { %178 = vst.msk [vmem:[#allocation11] sm:$0x1] %vm95_vm2, %v176_v46 }
 0x280   :  { %321 = shalt.err (!%p318_p10)
}
 0x281   :  { %188 = dma.vmem_to_hbm [thread:$0]  %s186_s10, 16, %s393_s4, [#allocation5]  }
 0x282   :  { %336 = dma.done.wait [#allocation5], 16  }
 0x283   :  { %337 = vsyncadd [#allocation5], 4294967280 }
 0x284   :  { %192 = vsyncpa [#allocation4], 1 }
 0x285   :  { %193 = vsyncpa [#allocation7], 1 }
 0x286   :  { %194 = vsyncpa [#allocation10], 1 }
 0x287   :  { %195 = vsyncpa [#allocation5], 1 }

</bundles_post_ra>
